<compile_context>
chip_gen: v5e
topology: v5e:2x2
jax: 0.10.0
libtpu: 0.0.40
codegen_flags: <defaults>
</compile_context>

<pallas_src>
import functools

import jax
import jax.numpy as jnp
import numpy as np
from jax.experimental import pallas as pl
from jax.experimental.pallas import tpu as pltpu


def _round_up(x, m):
    return ((x + m - 1) // m) * m


def _mlp_kernel(x_ref, wfc_t_ref, wproj_t_ref, o_ref, acc_ref):
    # x_ref:       (tm, E)   bf16
    # wfc_t_ref:   (E, th)   bf16  (columns th of W_fc^T)
    # wproj_t_ref: (th, E)   bf16  (rows   th of W_proj^T)
    # o_ref:       (tm, E)   x.dtype
    # acc_ref:     (tm, E)   f32 scratch, persistent across the hidden axis
    j = pl.program_id(1)

    @pl.when(j == 0)
    def _():
        acc_ref[...] = jnp.zeros_like(acc_ref)

    # First matmul slab: (tm, E) @ (E, th) -> (tm, th); bf16 operands, f32 acc.
    h = jnp.dot(x_ref[...], wfc_t_ref[...], preferred_element_type=jnp.float32)

    # relu(h)^2 — elementwise over the hidden dim (exact under H-tiling), f32 VPU.
    a = jnp.maximum(h, 0.0)
    a = a * a

    # Second matmul partial: (tm, th) @ (th, E) -> (tm, E); accumulate over hidden.
    acc_ref[...] += jnp.dot(a.astype(wproj_t_ref.dtype), wproj_t_ref[...],
                            preferred_element_type=jnp.float32)

    @pl.when(j == pl.num_programs(1) - 1)
    def _():
        o_ref[...] = acc_ref[...].astype(o_ref.dtype)


@functools.partial(jax.jit, static_argnames=("tm", "th", "compute_dtype"))
def mlp_forward(x, w_fc, w_proj, *, tm=256, th=512, compute_dtype=jnp.bfloat16):
    """Mirror MLP.forward.

    x:      (..., E)
    w_fc:   (4E, E)  -- PyTorch nn.Linear layout (out_features, in_features)
    w_proj: (E, 4E)
    returns (..., E) with the same dtype as x.
    """
    orig_shape = x.shape
    E = orig_shape[-1]
    H = w_fc.shape[0]                       # 4 * E
    M = int(np.prod(orig_shape[:-1]))
    out_dtype = x.dtype

    bpe = jnp.dtype(compute_dtype).itemsize

    # --- bf16 MXU operands (weights transposed once so both matmuls are (m,k)@(k,n)).
    x2 = x.reshape(M, E).astype(compute_dtype)
    wfc_t = w_fc.T.astype(compute_dtype)    # (E, H)
    wproj_t = w_proj.T.astype(compute_dtype)  # (H, E)

    # --- Token-tile size: large for arithmetic intensity, padded instead of asserted.
    tm = min(tm, _round_up(M, 8))
    n_m = pl.cdiv(M, tm)
    if n_m == 1 and M >= 256:
        # Keep >=2 tiles on the parallel axis so both v7x TensorCores get work.
        tm = _round_up((M + 1) // 2, 8)
        n_m = pl.cdiv(M, tm)
    m_pad = n_m * tm
    if m_pad != M:
        x2 = jnp.pad(x2, ((0, m_pad - M), (0, 0)))

    # --- Hidden-slab size: weight-resident when both bf16 weights fit VMEM easily,
    #     otherwise a lane-aligned slab (multiple of 128) that divides H.
    resident_bytes = 2 * (E * H * bpe) * 2        # both weights, double-buffered
    if resident_bytes <= 24 * 1024 * 1024:
        th = H
    else:
        th = min(th, H)
        while H % th != 0 and th > 128:
            th -= 128
        if H % th != 0:
            th = H
    n_h = H // th

    # --- VMEM budget (double-buffered inputs/outputs + f32 acc + f32 h/a staging).
    vmem_est = (2 * tm * E * bpe                  # x tile
                + 2 * E * th * bpe                # W_fc^T slab
                + 2 * th * E * bpe                # W_proj^T slab
                + 2 * tm * E * jnp.dtype(out_dtype).itemsize   # out tile
                + tm * E * 4                      # f32 accumulator scratch
                + 2 * tm * th * 4)                # f32 h/a intermediates
    vmem_limit = max(32 * 1024 * 1024,
                     min(int(vmem_est * 1.5) + (1 << 20), 110 * 1024 * 1024))

    cost = pl.CostEstimate(
        flops=4 * M * E * H,                      # two matmuls, 2*M*E*H each
        transcendentals=0,
        bytes_accessed=M * E * bpe + 2 * E * H * bpe
        + M * E * jnp.dtype(out_dtype).itemsize,
    )

    out = pl.pallas_call(
        _mlp_kernel,
        out_shape=jax.ShapeDtypeStruct((m_pad, E), out_dtype),
        grid=(n_m, n_h),
        in_specs=[
            pl.BlockSpec((tm, E), lambda i, j: (i, 0)),   # x tile: resident across j
            pl.BlockSpec((E, th), lambda i, j: (0, j)),   # W_fc^T hidden slab
            pl.BlockSpec((th, E), lambda i, j: (j, 0)),   # W_proj^T hidden slab
        ],
        out_specs=pl.BlockSpec((tm, E), lambda i, j: (i, 0)),  # same block across j
        scratch_shapes=[pltpu.VMEM((tm, E), jnp.float32)],
        compiler_params=pltpu.CompilerParams(
            dimension_semantics=("parallel", "arbitrary"),
            vmem_limit_bytes=vmem_limit,
        ),
        cost_estimate=cost,
    )(x2, wfc_t, wproj_t)

    return out[:M].reshape(orig_shape)


def _ref_mlp(x, w_fc, w_proj):
    h = x.reshape(-1, x.shape[-1]) @ w_fc.T
    a = jnp.maximum(h, 0.0) ** 2
    return (a @ w_proj.T).reshape(x.shape)


if __name__ == "__main__":
    key = jax.random.PRNGKey(0)
    k_x, k_fc, k_proj, k_x2 = jax.random.split(key, 4)

    # Small shapes consistent with the module: (batch, seq, n_embd), hidden = 4*n_embd.
    batch, seq, n_embd = 2, 8, 32
    hidden = 4 * n_embd

    x = jax.random.normal(k_x, (batch, seq, n_embd), dtype=jnp.float32)
    w_fc = jax.random.normal(k_fc, (hidden, n_embd), dtype=jnp.float32) / np.sqrt(n_embd)
    w_proj = jax.random.normal(k_proj, (n_embd, hidden), dtype=jnp.float32) / np.sqrt(hidden)

    out = mlp_forward(x, w_fc, w_proj)
    jax.block_until_ready(out)

    ref = _ref_mlp(x, w_fc, w_proj)
    assert out.shape == x.shape and out.dtype == x.dtype
    # bf16 MXU operands (f32 accumulation) -> loosened tolerance vs. the f32 ref.
    assert jnp.allclose(out, ref, atol=1e-1, rtol=1e-1), (
        float(jnp.max(jnp.abs(out - ref))))

    # Ragged token count (M = 15) exercises the pad-to-tile path.
    x_r = jax.random.normal(k_x2, (3, 5, n_embd), dtype=jnp.float32)
    out_r = mlp_forward(x_r, w_fc, w_proj)
    jax.block_until_ready(out_r)
    ref_r = _ref_mlp(x_r, w_fc, w_proj)
    assert jnp.allclose(out_r, ref_r, atol=1e-1, rtol=1e-1), (
        float(jnp.max(jnp.abs(out_r - ref_r))))

    # The module zero-initializes c_proj.weight; with that init the forward is
    # identically zero. Check that path too (init detail, same forward math).
    out_zero = mlp_forward(x, w_fc, jnp.zeros_like(w_proj))
    jax.block_until_ready(out_zero)
    assert jnp.allclose(out_zero, jnp.zeros_like(out_zero))

    print("KERNEL_OK")
</pallas_src>

<mosaic_0001>
module attributes {stable_mosaic.version = 11 : i64} {
  func.func @_mlp_kernel(%arg0: i32, %arg1: i32, %arg2: memref<16x32xbf16, #tpu.memory_space<vmem>>, %arg3: memref<32x128xbf16, #tpu.memory_space<vmem>>, %arg4: memref<128x32xbf16, #tpu.memory_space<vmem>>, %arg5: memref<16x32xf32, #tpu.memory_space<vmem>>, %arg6: memref<16x32xf32, #tpu.memory_space<vmem>>) attributes {dimension_semantics = [#tpu.dimension_semantics<parallel>, #tpu.dimension_semantics<arbitrary>], iteration_bounds = array<i64: 1, 1>, scalar_prefetch = 0 : i64, scratch_operands = 1 : i64, tpu.core_type = #tpu.core_type<tc>, window_params = [{transform_indices = @transform_0, window_bounds = array<i64: 16, 32>}, {transform_indices = @transform_1, window_bounds = array<i64: 32, 128>}, {transform_indices = @transform_2, window_bounds = array<i64: 128, 32>}, {transform_indices = @transform_3, window_bounds = array<i64: 16, 32>}]} {
    %c0_i32 = arith.constant 0 : i32
    %0 = arith.cmpi eq, %arg1, %c0_i32 : i32
    %1 = arith.extui %0 : i1 to i32
    %c0_i32_0 = arith.constant 0 : i32
    %2 = arith.cmpi ne, %1, %c0_i32_0 : i32
    scf.if %2 {
      %cst_14 = arith.constant 0.000000e+00 : f32
      %18 = vector.broadcast %cst_14 : f32 to vector<16x32xf32>
      %c0_15 = arith.constant 0 : index
      %c0_16 = arith.constant 0 : index
      %19 = vector.load %arg6[%c0_15, %c0_16] : memref<16x32xf32, #tpu.memory_space<vmem>>, vector<16x32xf32>
      tpu.vector_store %arg6[%c0_15, %c0_16], %18 {strides = array<i32>} : memref<16x32xf32, #tpu.memory_space<vmem>>, vector<16x32xf32>,
    } else {
    }
    %c0 = arith.constant 0 : index
    %c0_1 = arith.constant 0 : index
    %3 = vector.load %arg2[%c0, %c0_1] : memref<16x32xbf16, #tpu.memory_space<vmem>>, vector<16x32xbf16>
    %c0_2 = arith.constant 0 : index
    %c0_3 = arith.constant 0 : index
    %4 = vector.load %arg3[%c0_2, %c0_3] : memref<32x128xbf16, #tpu.memory_space<vmem>>, vector<32x128xbf16>
    %cst = arith.constant dense<0.000000e+00> : vector<16x128xf32>
    %5 = tpu.matmul %3, %4, %cst {dimension_numbers = #tpu.dot_dimension_numbers<[1], [0], [0], [1], [0, 0, 1, 1], [], []>} : vector<16x32xbf16>, vector<32x128xbf16>, vector<16x128xf32> -> vector<16x128xf32>
    %cst_4 = arith.constant 0.000000e+00 : f32
    %6 = vector.broadcast %cst_4 : f32 to vector<16x128xf32>
    %7 = arith.maximumf %5, %6 : vector<16x128xf32>
    %8 = arith.mulf %7, %7 : vector<16x128xf32>
    %c0_5 = arith.constant 0 : index
    %c0_6 = arith.constant 0 : index
    %9 = vector.load %arg6[%c0_5, %c0_6] : memref<16x32xf32, #tpu.memory_space<vmem>>, vector<16x32xf32>
    %10 = arith.truncf %8 : vector<16x128xf32> to vector<16x128xbf16>
    %c0_7 = arith.constant 0 : index
    %c0_8 = arith.constant 0 : index
    %11 = vector.load %arg4[%c0_7, %c0_8] : memref<128x32xbf16, #tpu.memory_space<vmem>>, vector<128x32xbf16>
    %cst_9 = arith.constant dense<0.000000e+00> : vector<16x32xf32>
    %12 = tpu.matmul %10, %11, %cst_9 {dimension_numbers = #tpu.dot_dimension_numbers<[1], [0], [0], [1], [0, 0, 1, 1], [], []>} : vector<16x128xbf16>, vector<128x32xbf16>, vector<16x32xf32> -> vector<16x32xf32>
    %13 = arith.addf %9, %12 : vector<16x32xf32>
    %c0_10 = arith.constant 0 : index
    %c0_11 = arith.constant 0 : index
    %14 = vector.load %arg6[%c0_10, %c0_11] : memref<16x32xf32, #tpu.memory_space<vmem>>, vector<16x32xf32>
    tpu.vector_store %arg6[%c0_10, %c0_11], %13 {strides = array<i32>} : memref<16x32xf32, #tpu.memory_space<vmem>>, vector<16x32xf32>,
    %c0_i32_12 = arith.constant 0 : i32
    %15 = arith.cmpi eq, %arg1, %c0_i32_12 : i32
    %16 = arith.extui %15 : i1 to i32
    %c0_i32_13 = arith.constant 0 : i32
    %17 = arith.cmpi ne, %16, %c0_i32_13 : i32
    scf.if %17 {
      %c0_14 = arith.constant 0 : index
      %c0_15 = arith.constant 0 : index
      %18 = vector.load %arg6[%c0_14, %c0_15] : memref<16x32xf32, #tpu.memory_space<vmem>>, vector<16x32xf32>
      %c0_16 = arith.constant 0 : index
      %c0_17 = arith.constant 0 : index
      %19 = vector.load %arg5[%c0_16, %c0_17] : memref<16x32xf32, #tpu.memory_space<vmem>>, vector<16x32xf32>
      tpu.vector_store %arg5[%c0_16, %c0_17], %18 {strides = array<i32>} : memref<16x32xf32, #tpu.memory_space<vmem>>, vector<16x32xf32>,
    } else {
    }
    return
  }
  func.func @transform_0(%arg0: i32, %arg1: i32) -> (i32, i32) {
    %c0_i32 = arith.constant 0 : i32
    %c0_i32_0 = arith.constant 0 : i32
    return %arg0, %c0_i32 : i32, i32
  }
  func.func @transform_1(%arg0: i32, %arg1: i32) -> (i32, i32) {
    %c0_i32 = arith.constant 0 : i32
    %c0_i32_0 = arith.constant 0 : i32
    return %c0_i32, %arg1 : i32, i32
  }
  func.func @transform_2(%arg0: i32, %arg1: i32) -> (i32, i32) {
    %c0_i32 = arith.constant 0 : i32
    %c0_i32_0 = arith.constant 0 : i32
    return %arg1, %c0_i32 : i32, i32
  }
  func.func @transform_3(%arg0: i32, %arg1: i32) -> (i32, i32) {
    %c0_i32 = arith.constant 0 : i32
    %c0_i32_0 = arith.constant 0 : i32
    return %arg0, %c0_i32 : i32, i32
  }
}

</mosaic_0001>

<bundles_post_ra>
// kernel: mlp_forward.1
= control target key start
LH: loop header
LB: loop body
LE: loop exit
PB: predicated region body
PF: predicated region fallthrough
CT: control target
= control target key end

     0   :  { %s331_s0 = inlined_call_operand.vmem [shape: bf16[16,32], index: 0, kind: input, shape index: {}]   ;;  %s332_s1 = inlined_call_operand.vmem [shape: bf16[32,128], index: 1, kind: input, shape index: {}]   ;;  %s333_s2 = inlined_call_operand.vmem [shape: bf16[128,32], index: 2, kind: input, shape index: {}]   ;;  %s334_s3 = inlined_call_operand.hbm [shape: f32[16,32], index: 3, kind: output, shape index: {}]  }
   0x1   :  { %v225_v0 = vld [vmem:[%s332_s1 + $0x8] sm:$0xff]  ;;  %v233_v1 = vld [vmem:[%s333_s2 + $0x38] sm:$0xff]  ;;  %v224_v2 = vld [vmem:[%s332_s1] sm:$0xff] }
   0x2   :  { %56 = vmatpush.bf16.msra.mxu0 %v225_v0 }
   0x3   :  { %8 = vsyncpa [#allocation4], 0  ;;  %135 = vmatpush.bf16.msra.mxu1 %v233_v1  ;;  %v232_v3 = vld [vmem:[%s333_s2 + $0x30] sm:$0xff]  ;;  %v223_v4 = vld [vmem:[%s331_s0] sm:$0xff]  ;;  %vm20_vm0 = vcmask 261120   ;;  %v264_v11 = vmov 0.0  }
   0x4   :  { %v231_v5 = vld [vmem:[%s333_s2 + $0x28] sm:$0xff]  ;;  %v230_v6 = vld [vmem:[%s333_s2 + $0x20] sm:$0xff]  ;;  %v229_v7 = vld [vmem:[%s333_s2 + $0x18] sm:$0xff]  ;;  %21 = vst.msk [vmem:[#allocation2] sm:$0xff] %vm20_vm0, %v264_v11  ;;  %s166_s8 = sshll.u32 %s334_s3, 4  ;;  %s266_s9 = smov 128   ;;  %s167_s8 = int_to_ptr.hbm [resolvable:$true] %s166_s8 }
   0x5   :  { %v228_v8 = vld [vmem:[%s333_s2 + $0x10] sm:$0xff]  ;;  %v227_v9 = vld [vmem:[%s333_s2 + $0x8] sm:$0xff]  ;;  %v226_v10 = vld [vmem:[%s333_s2] sm:$0xff]  ;;  %22 = vst.msk [vmem:[#allocation2 + $0x8] sm:$0xff] %vm20_vm0, %v264_v11  ;;  %s265_s2 = smov [#allocation3]   ;;  %s267_s10 = smov 8  }
   0x6   :  { %57 = vmatpush.bf16.msra.mxu0 %v224_v2  ;;  %s164_s5 = sshll.u32 %s265_s2, 4  ;;  %s165_s5 = int_to_ptr.vmem [resolvable:$true] %s164_s5 }
   0x7   :  { %136 = vmatpush.bf16.msra.mxu1 %v232_v3 }
   0x9   :  { %190 = vmatmul.msk.bf16.vlgmr.msra.gmra.mxu0 %vm20_vm0, %v223_v4 }
   0xb   :  { %137 = vmatpush.bf16.msra.mxu1 %v231_v5  ;;  %v68_v19 = vld [vmem:[#allocation2] sm:$0xff] }
   0xc   :  { %v69_v22 = vld [vmem:[#allocation2 + $0x8] sm:$0xff] }
   0xf   :  { %138 = vmatpush.bf16.msra.mxu1 %v230_v6 }
  0x13   :  { %139 = vmatpush.bf16.msra.mxu1 %v229_v7 }
  0x17   :  { %140 = vmatpush.bf16.msra.mxu1 %v228_v8 }
  0x1b   :  { %141 = vmatpush.bf16.msra.mxu1 %v227_v9 }
  0x1f   :  { %142 = vmatpush.bf16.msra.mxu1 %v226_v10 }
  0x86   :  { %v59_v12 = vpop.f32.mrf.mxu0 }
  0x87   :  { %v64_v13 = vmax.f32 %v59_v12, 0.0 }
  0x89   :  { %v66_v16 = vmul.f32 %v64_v13, %v64_v13 }
  0x8e   :  { %v61_v14 = vpop.f32.mrf.mxu0 }
  0x8f   :  { %v65_v15 = vmax.f32 %v61_v14, 0.0 }
  0x91   :  { %v67_v17 = vmul.f32 %v65_v15, %v65_v15 }
  0x93   :  { %v70_v18 = vpack.c.bf16 %v67_v17, %v66_v16 }
  0x95   :  { %143 = vmatmul.bf16.vlgmr.msra.gmra.mxu1 %v70_v18 }
 0x112   :  { %v144_v20 = vpop.f32.mrf.mxu1 }
 0x113   :  { %v149_v21 = vadd.f32 %v144_v20, %v68_v19 }
 0x115   :  { %151 = vst.msk [vmem:[#allocation2] sm:$0xff] %vm20_vm0, %v149_v21 }
 0x11a   :  { %v146_v23 = vpop.f32.mrf.mxu1 }
 0x11b   :  { %v150_v24 = vadd.f32 %v146_v23, %v69_v22 }
 0x11c   :  { %v156_v25 = vld [vmem:[#allocation2] sm:$0xff] }
 0x11d   :  { %152 = vst.msk [vmem:[#allocation2 + $0x8] sm:$0xff] %vm20_vm0, %v150_v24 }
 0x11e   :  { %158 = vst.msk [vmem:[#allocation3] sm:$0xff] %vm20_vm0, %v156_v25 }
 0x124   :  { %v157_v26 = vld [vmem:[#allocation2 + $0x8] sm:$0xff] }
 0x125   :  { %159 = vst.msk [vmem:[#allocation3 + $0x8] sm:$0xff] %vm20_vm0, %v157_v26 }
 0x126   :  { %172 = dma.vmem_to_hbm [thread:$0]  %s165_s5, 256, %s167_s8, [#allocation4], %s266_s9, %s266_s9, %s267_s10  }
 0x127   :  { %262 = dma.done.wait [#allocation4], 256  }
 0x128   :  { %263 = vsyncadd [#allocation4], 4294967040 }
 0x129   :  { %177 = vsyncpa [#allocation4], 1 }

</bundles_post_ra>
